<compile_context>
chip_gen: v6e
topology: v6e:2x2x1
jax: 0.10.0
libtpu: 0.0.40
codegen_flags: <defaults>
</compile_context>

<pallas_src>
import jax
import jax.numpy as jnp
from jax.experimental import pallas as pl
from jax.experimental.pallas import tpu as pltpu


_OUT_COLS = 4  # packed per-sample columns: [masked_ce, mask, pseudo_label, confidence]


def _mcd_self_training_kernel(thr_ref, y_ref, yt_ref, out_ref):
    tb, C = y_ref.shape               # batch tile, number of classes
    NC = yt_ref.shape[1]              # N * C: MCD passes sit side by side on lanes
    N = NC // C                       # number of MCD inferences (static)

    thr = thr_ref[0]                  # SMEM scalar
    neg_big = jnp.float32(jnp.finfo(jnp.float32).min)

    yt = yt_ref[...].astype(jnp.float32)                               # (tb, NC)

    # --- per-pass max, broadcast back onto the full lane slab ----------------
    lane_nc = jax.lax.broadcasted_iota(jnp.int32, (tb, NC), 1)
    max_slab = jnp.zeros((tb, NC), jnp.float32)
    for n in range(N):                                  # N is small & static
        m_n = jnp.max(yt[:, n * C:(n + 1) * C], axis=-1, keepdims=True)   # (tb, 1)
        in_seg = (lane_nc >= n * C) & (lane_nc < (n + 1) * C)
        max_slab = jnp.where(in_seg, m_n, max_slab)

    # --- ONE exp over the whole slab (full 128-lane EUP/VPU utilization) -----
    e = jnp.exp(yt - max_slab)                                         # (tb, NC)

    # --- per-pass normalization (one divide per row per pass) + mean over N --
    avg = jnp.zeros((tb, C), jnp.float32)
    for n in range(N):
        en = e[:, n * C:(n + 1) * C]                                   # (tb, C)
        s_n = jnp.sum(en, axis=-1, keepdims=True)                      # (tb, 1)
        avg = avg + en * (1.0 / s_n)
    avg = avg * jnp.float32(1.0 / N)          # exact when N is a power of two

    # --- confidence, first-occurrence argmax, confidence mask ----------------
    conf = jnp.max(avg, axis=-1, keepdims=True)                        # (tb, 1)
    lane_c = jax.lax.broadcasted_iota(jnp.int32, (tb, C), 1)
    pseudo = jnp.min(jnp.where(avg >= conf, lane_c, C), axis=-1, keepdims=True)
    mask = (conf >= thr).astype(jnp.float32)                           # (tb, 1)

    # --- per-sample cross entropy: logsumexp(y) - y[pseudo] ------------------
    y = y_ref[...].astype(jnp.float32)
    ym = jnp.max(y, axis=-1, keepdims=True)
    lse = ym + jnp.log(jnp.sum(jnp.exp(y - ym), axis=-1, keepdims=True))
    y_sel = jnp.max(jnp.where(lane_c == pseudo, y, neg_big), axis=-1, keepdims=True)
    ce = lse - y_sel                                                   # (tb, 1)

    # --- pack the four per-sample columns into a single (tb, 4) store --------
    col = jax.lax.broadcasted_iota(jnp.int32, (tb, _OUT_COLS), 1)
    packed = jnp.where(col == 0, ce * mask,
             jnp.where(col == 1, mask,
             jnp.where(col == 2, pseudo.astype(jnp.float32), conf)))
    out_ref[...] = packed


def _pick_block_b(B, N, C, itemsize):
    """Batch-tile size: as large as a conservative VMEM budget allows, but never
    so large that a big batch ends up with fewer than ~4 grid steps (v7x 2-TC
    sharding + DMA/compute overlap)."""
    itemsize = int(itemsize)
    align = max(8, 32 // max(itemsize, 1))          # 8 f32 / 16 bf16 / 32 int8
    budget = 8 * 1024 * 1024                        # double-buffered blocks, << scoped VMEM
    per_row = 2 * ((N * C + C) * itemsize + _OUT_COLS * 4)
    tb = min(4096, budget // max(per_row, 1))
    quarter = -(-B // 4)                            # ceil(B / 4)
    quarter = -(-quarter // align) * align          # round up to sublane packing
    tb = min(tb, max(quarter, align))
    return max(align, (tb // align) * align)


def mcd_uncertainty_self_training_loss(y, y_target, threshold, *, block_b=None):
    """y: (B, C) logits; y_target: (B, N, C) MCD logits.
    Returns (loss, mask, pseudo_labels(int32), confidence)."""
    B, C = y.shape
    Bt, N, Ct = y_target.shape
    assert Bt == B and Ct == C
    NC = N * C

    # Lane-compact 2-D view of the MCD logits (free, contiguous reshape).
    yt2 = y_target.reshape(B, NC)

    itemsize = max(jnp.dtype(y.dtype).itemsize, jnp.dtype(y_target.dtype).itemsize)
    if block_b is None:
        tb = _pick_block_b(B, N, C, itemsize)
    else:
        tb = max(8, (int(block_b) // 8) * 8)
    n_tiles = pl.cdiv(B, tb)     # ragged last tile handled by Pallas (no jnp.pad copy)

    thr = jnp.full((1,), threshold, dtype=jnp.float32)

    out = pl.pallas_call(
        _mcd_self_training_kernel,
        out_shape=jax.ShapeDtypeStruct((B, _OUT_COLS), jnp.float32),
        grid=(n_tiles,),
        in_specs=[
            pl.BlockSpec(memory_space=pltpu.MemorySpace.SMEM),      # threshold
            pl.BlockSpec((tb, C), lambda i: (i, 0)),                # y
            pl.BlockSpec((tb, NC), lambda i: (i, 0)),               # y_target slab
        ],
        out_specs=pl.BlockSpec((tb, _OUT_COLS), lambda i: (i, 0)),
        compiler_params=pltpu.CompilerParams(
            dimension_semantics=("parallel",)),
    )(thr, y, yt2)

    # Rows >= B never exist in `out` (OOB writes dropped), so the loss is exact.
    loss = jnp.sum(out[:, 0]) / jnp.float32(B)
    mask = out[:, 1]
    pseudo = out[:, 2].astype(jnp.int32)    # exact: pseudo < C << 2**24
    conf = out[:, 3]
    return loss, mask, pseudo, conf


def _reference(y, y_target, threshold):
    probs = jax.nn.softmax(y_target, axis=2).mean(axis=1)
    conf = probs.max(axis=1)
    pseudo = probs.argmax(axis=1).astype(jnp.int32)
    mask = (conf >= threshold).astype(jnp.float32)
    logp = jax.nn.log_softmax(y, axis=1)
    ce = -jnp.take_along_axis(logp, pseudo[:, None], axis=1)[:, 0]
    loss = jnp.mean(ce * mask)
    return loss, mask, pseudo, conf, ce


def _check(key, B, N, C, threshold, **kw):
    ky, kt = jax.random.split(key)
    y = jax.random.normal(ky, (B, C), dtype=jnp.float32)
    y_target = jax.random.normal(kt, (B, N, C), dtype=jnp.float32)

    out = mcd_uncertainty_self_training_loss(y, y_target, threshold, **kw)
    out = jax.block_until_ready(out)
    loss, mask, pseudo, conf = out

    rloss, rmask, rpseudo, rconf, rce = _reference(y, y_target, threshold)

    assert jnp.allclose(conf, rconf, atol=1e-5), ("confidence mismatch", B, N, C)
    assert jnp.array_equal(pseudo, rpseudo), ("pseudo-label mismatch", B, N, C)
    # mask must match except for samples sitting numerically on the threshold
    safe = jnp.abs(rconf - threshold) > 1e-5
    assert bool(jnp.all(~safe | (mask == rmask))), ("mask mismatch", B, N, C)
    # loss checked against a reference using the kernel's own mask, so an
    # ulp-level flip exactly at the threshold cannot fail the check
    rloss_kmask = jnp.mean(rce * mask)
    assert jnp.allclose(loss, rloss_kmask, atol=1e-5, rtol=1e-5), \
        ("loss mismatch", float(loss), float(rloss_kmask), float(rloss))


if __name__ == "__main__":
    base = jax.random.PRNGKey(0)
    # shapes implied by the module: y (minibatch, C), y_target (minibatch, N, C)
    _check(base, B=8, N=4, C=32, threshold=0.1)                # single tile
    # multi-tile path with a ragged last tile (tb=80 -> 4 grid steps over 300 rows)
    _check(jax.random.fold_in(base, 1), B=300, N=4, C=32, threshold=0.1)
    print("KERNEL_OK")
</pallas_src>

<mosaic_0001>
module attributes {stable_mosaic.version = 11 : i64} {
  func.func @_mcd_self_training_kernel(%arg0: i32, %arg1: memref<1xf32, #tpu.memory_space<smem>>, %arg2: memref<8x32xf32, #tpu.memory_space<vmem>>, %arg3: memref<8x128xf32, #tpu.memory_space<vmem>>, %arg4: memref<8x4xf32, #tpu.memory_space<vmem>>) attributes {dimension_semantics = [#tpu.dimension_semantics<parallel>], iteration_bounds = array<i64: 1>, scalar_prefetch = 0 : i64, scratch_operands = 0 : i64, tpu.core_type = #tpu.core_type<tc>, window_params = [{transform_indices = @transform_0, window_bounds = array<i64: 1>}, {transform_indices = @transform_1, window_bounds = array<i64: 8, 32>}, {transform_indices = @transform_2, window_bounds = array<i64: 8, 128>}, {transform_indices = @transform_3, window_bounds = array<i64: 8, 4>}]} {
    %c0 = arith.constant 0 : index
    %0 = memref.load %arg1[%c0] : memref<1xf32, #tpu.memory_space<smem>>
    %c0_0 = arith.constant 0 : index
    %c0_1 = arith.constant 0 : index
    %1 = vector.load %arg3[%c0_0, %c0_1] : memref<8x128xf32, #tpu.memory_space<vmem>>, vector<8x128xf32>
    %2 = tpu.iota {dimensions = array<i32: 1>} : vector<8x128xi32>
    %cst = arith.constant 0.000000e+00 : f32
    %3 = vector.broadcast %cst : f32 to vector<8x128xf32>
    %4 = vector.extract_strided_slice %1 {offsets = [0, 0], sizes = [8, 32], strides = [1, 1]} : vector<8x128xf32> to vector<8x32xf32>
    %cst_2 = arith.constant dense<0xFF800000> : vector<8xf32>
    %5 = vector.multi_reduction <maximumf>, %4, %cst_2 [1] : vector<8x32xf32> to vector<8xf32>
    %6 = vector.shape_cast %5 : vector<8xf32> to vector<8x1xf32>
    %c0_i32 = arith.constant 0 : i32
    %7 = vector.broadcast %c0_i32 : i32 to vector<8x128xi32>
    %8 = arith.cmpi sge, %2, %7 : vector<8x128xi32>
    %c32_i32 = arith.constant 32 : i32
    %9 = vector.broadcast %c32_i32 : i32 to vector<8x128xi32>
    %10 = arith.cmpi slt, %2, %9 : vector<8x128xi32>
    %11 = arith.andi %8, %10 : vector<8x128xi1>
    %12 = vector.shape_cast %6 : vector<8x1xf32> to vector<8x1xf32>
    %13 = vector.broadcast %12 : vector<8x1xf32> to vector<8x128xf32>
    %14 = arith.select %11, %13, %3 : vector<8x128xi1>, vector<8x128xf32>
    %15 = vector.extract_strided_slice %1 {offsets = [0, 32], sizes = [8, 32], strides = [1, 1]} : vector<8x128xf32> to vector<8x32xf32>
    %cst_3 = arith.constant dense<0xFF800000> : vector<8xf32>
    %16 = vector.multi_reduction <maximumf>, %15, %cst_3 [1] : vector<8x32xf32> to vector<8xf32>
    %17 = vector.shape_cast %16 : vector<8xf32> to vector<8x1xf32>
    %c32_i32_4 = arith.constant 32 : i32
    %18 = vector.broadcast %c32_i32_4 : i32 to vector<8x128xi32>
    %19 = arith.cmpi sge, %2, %18 : vector<8x128xi32>
    %c64_i32 = arith.constant 64 : i32
    %20 = vector.broadcast %c64_i32 : i32 to vector<8x128xi32>
    %21 = arith.cmpi slt, %2, %20 : vector<8x128xi32>
    %22 = arith.andi %19, %21 : vector<8x128xi1>
    %23 = vector.shape_cast %17 : vector<8x1xf32> to vector<8x1xf32>
    %24 = vector.broadcast %23 : vector<8x1xf32> to vector<8x128xf32>
    %25 = arith.select %22, %24, %14 : vector<8x128xi1>, vector<8x128xf32>
    %26 = vector.extract_strided_slice %1 {offsets = [0, 64], sizes = [8, 32], strides = [1, 1]} : vector<8x128xf32> to vector<8x32xf32>
    %cst_5 = arith.constant dense<0xFF800000> : vector<8xf32>
    %27 = vector.multi_reduction <maximumf>, %26, %cst_5 [1] : vector<8x32xf32> to vector<8xf32>
    %28 = vector.shape_cast %27 : vector<8xf32> to vector<8x1xf32>
    %c64_i32_6 = arith.constant 64 : i32
    %29 = vector.broadcast %c64_i32_6 : i32 to vector<8x128xi32>
    %30 = arith.cmpi sge, %2, %29 : vector<8x128xi32>
    %c96_i32 = arith.constant 96 : i32
    %31 = vector.broadcast %c96_i32 : i32 to vector<8x128xi32>
    %32 = arith.cmpi slt, %2, %31 : vector<8x128xi32>
    %33 = arith.andi %30, %32 : vector<8x128xi1>
    %34 = vector.shape_cast %28 : vector<8x1xf32> to vector<8x1xf32>
    %35 = vector.broadcast %34 : vector<8x1xf32> to vector<8x128xf32>
    %36 = arith.select %33, %35, %25 : vector<8x128xi1>, vector<8x128xf32>
    %37 = vector.extract_strided_slice %1 {offsets = [0, 96], sizes = [8, 32], strides = [1, 1]} : vector<8x128xf32> to vector<8x32xf32>
    %cst_7 = arith.constant dense<0xFF800000> : vector<8xf32>
    %38 = vector.multi_reduction <maximumf>, %37, %cst_7 [1] : vector<8x32xf32> to vector<8xf32>
    %39 = vector.shape_cast %38 : vector<8xf32> to vector<8x1xf32>
    %c96_i32_8 = arith.constant 96 : i32
    %40 = vector.broadcast %c96_i32_8 : i32 to vector<8x128xi32>
    %41 = arith.cmpi sge, %2, %40 : vector<8x128xi32>
    %c128_i32 = arith.constant 128 : i32
    %42 = vector.broadcast %c128_i32 : i32 to vector<8x128xi32>
    %43 = arith.cmpi slt, %2, %42 : vector<8x128xi32>
    %44 = arith.andi %41, %43 : vector<8x128xi1>
    %45 = vector.shape_cast %39 : vector<8x1xf32> to vector<8x1xf32>
    %46 = vector.broadcast %45 : vector<8x1xf32> to vector<8x128xf32>
    %47 = arith.select %44, %46, %36 : vector<8x128xi1>, vector<8x128xf32>
    %48 = arith.subf %1, %47 : vector<8x128xf32>
    %49 = math.exp %48 : vector<8x128xf32>
    %cst_9 = arith.constant 0.000000e+00 : f32
    %50 = vector.broadcast %cst_9 : f32 to vector<8x32xf32>
    %51 = vector.extract_strided_slice %49 {offsets = [0, 0], sizes = [8, 32], strides = [1, 1]} : vector<8x128xf32> to vector<8x32xf32>
    %cst_10 = arith.constant dense<0.000000e+00> : vector<8xf32>
    %52 = vector.multi_reduction <add>, %51, %cst_10 [1] : vector<8x32xf32> to vector<8xf32>
    %53 = vector.shape_cast %52 : vector<8xf32> to vector<8x1xf32>
    %cst_11 = arith.constant 1.000000e+00 : f32
    %54 = vector.broadcast %cst_11 : f32 to vector<8x1xf32>
    %55 = arith.divf %54, %53 : vector<8x1xf32>
    %56 = vector.broadcast %55 : vector<8x1xf32> to vector<8x32xf32>
    %57 = arith.mulf %51, %56 : vector<8x32xf32>
    %58 = arith.addf %50, %57 : vector<8x32xf32>
    %59 = vector.extract_strided_slice %49 {offsets = [0, 32], sizes = [8, 32], strides = [1, 1]} : vector<8x128xf32> to vector<8x32xf32>
    %cst_12 = arith.constant dense<0.000000e+00> : vector<8xf32>
    %60 = vector.multi_reduction <add>, %59, %cst_12 [1] : vector<8x32xf32> to vector<8xf32>
    %61 = vector.shape_cast %60 : vector<8xf32> to vector<8x1xf32>
    %cst_13 = arith.constant 1.000000e+00 : f32
    %62 = vector.broadcast %cst_13 : f32 to vector<8x1xf32>
    %63 = arith.divf %62, %61 : vector<8x1xf32>
    %64 = vector.broadcast %63 : vector<8x1xf32> to vector<8x32xf32>
    %65 = arith.mulf %59, %64 : vector<8x32xf32>
    %66 = arith.addf %58, %65 : vector<8x32xf32>
    %67 = vector.extract_strided_slice %49 {offsets = [0, 64], sizes = [8, 32], strides = [1, 1]} : vector<8x128xf32> to vector<8x32xf32>
    %cst_14 = arith.constant dense<0.000000e+00> : vector<8xf32>
    %68 = vector.multi_reduction <add>, %67, %cst_14 [1] : vector<8x32xf32> to vector<8xf32>
    %69 = vector.shape_cast %68 : vector<8xf32> to vector<8x1xf32>
    %cst_15 = arith.constant 1.000000e+00 : f32
    %70 = vector.broadcast %cst_15 : f32 to vector<8x1xf32>
    %71 = arith.divf %70, %69 : vector<8x1xf32>
    %72 = vector.broadcast %71 : vector<8x1xf32> to vector<8x32xf32>
    %73 = arith.mulf %67, %72 : vector<8x32xf32>
    %74 = arith.addf %66, %73 : vector<8x32xf32>
    %75 = vector.extract_strided_slice %49 {offsets = [0, 96], sizes = [8, 32], strides = [1, 1]} : vector<8x128xf32> to vector<8x32xf32>
    %cst_16 = arith.constant dense<0.000000e+00> : vector<8xf32>
    %76 = vector.multi_reduction <add>, %75, %cst_16 [1] : vector<8x32xf32> to vector<8xf32>
    %77 = vector.shape_cast %76 : vector<8xf32> to vector<8x1xf32>
    %cst_17 = arith.constant 1.000000e+00 : f32
    %78 = vector.broadcast %cst_17 : f32 to vector<8x1xf32>
    %79 = arith.divf %78, %77 : vector<8x1xf32>
    %80 = vector.broadcast %79 : vector<8x1xf32> to vector<8x32xf32>
    %81 = arith.mulf %75, %80 : vector<8x32xf32>
    %82 = arith.addf %74, %81 : vector<8x32xf32>
    %cst_18 = arith.constant 2.500000e-01 : f32
    %83 = vector.broadcast %cst_18 : f32 to vector<8x32xf32>
    %84 = arith.mulf %82, %83 : vector<8x32xf32>
    %cst_19 = arith.constant dense<0xFF800000> : vector<8xf32>
    %85 = vector.multi_reduction <maximumf>, %84, %cst_19 [1] : vector<8x32xf32> to vector<8xf32>
    %86 = vector.shape_cast %85 : vector<8xf32> to vector<8x1xf32>
    %87 = tpu.iota {dimensions = array<i32: 1>} : vector<8x32xi32>
    %88 = vector.broadcast %86 : vector<8x1xf32> to vector<8x32xf32>
    %89 = arith.cmpf oge, %84, %88 : vector<8x32xf32>
    %c32_i32_20 = arith.constant 32 : i32
    %90 = vector.broadcast %c32_i32_20 : i32 to vector<8x32xi32>
    %91 = arith.select %89, %87, %90 : vector<8x32xi1>, vector<8x32xi32>
    %cst_21 = arith.constant dense<2147483647> : vector<8xi32>
    %92 = vector.multi_reduction <minsi>, %91, %cst_21 [1] : vector<8x32xi32> to vector<8xi32>
    %93 = vector.shape_cast %92 : vector<8xi32> to vector<8x1xi32>
    %94 = vector.broadcast %0 : f32 to vector<8x1xf32>
    %95 = arith.cmpf oge, %86, %94 : vector<8x1xf32>
    %96 = arith.extui %95 : vector<8x1xi1> to vector<8x1xi32>
    %97 = arith.sitofp %96 : vector<8x1xi32> to vector<8x1xf32>
    %c0_22 = arith.constant 0 : index
    %c0_23 = arith.constant 0 : index
    %98 = vector.load %arg2[%c0_22, %c0_23] : memref<8x32xf32, #tpu.memory_space<vmem>>, vector<8x32xf32>
    %cst_24 = arith.constant dense<0xFF800000> : vector<8xf32>
    %99 = vector.multi_reduction <maximumf>, %98, %cst_24 [1] : vector<8x32xf32> to vector<8xf32>
    %100 = vector.shape_cast %99 : vector<8xf32> to vector<8x1xf32>
    %101 = vector.broadcast %100 : vector<8x1xf32> to vector<8x32xf32>
    %102 = arith.subf %98, %101 : vector<8x32xf32>
    %103 = math.exp %102 : vector<8x32xf32>
    %cst_25 = arith.constant dense<0.000000e+00> : vector<8xf32>
    %104 = vector.multi_reduction <add>, %103, %cst_25 [1] : vector<8x32xf32> to vector<8xf32>
    %105 = vector.shape_cast %104 : vector<8xf32> to vector<8x1xf32>
    %106 = math.log %105 : vector<8x1xf32>
    %107 = arith.addf %100, %106 : vector<8x1xf32>
    %108 = vector.broadcast %93 : vector<8x1xi32> to vector<8x32xi32>
    %109 = arith.cmpi eq, %87, %108 : vector<8x32xi32>
    %cst_26 = arith.constant -3.40282347E+38 : f32
    %110 = vector.broadcast %cst_26 : f32 to vector<8x32xf32>
    %111 = arith.select %109, %98, %110 : vector<8x32xi1>, vector<8x32xf32>
    %cst_27 = arith.constant dense<0xFF800000> : vector<8xf32>
    %112 = vector.multi_reduction <maximumf>, %111, %cst_27 [1] : vector<8x32xf32> to vector<8xf32>
    %113 = vector.shape_cast %112 : vector<8xf32> to vector<8x1xf32>
    %114 = arith.subf %107, %113 : vector<8x1xf32>
    %115 = tpu.iota {dimensions = array<i32: 1>} : vector<8x4xi32>
    %c0_i32_28 = arith.constant 0 : i32
    %116 = vector.broadcast %c0_i32_28 : i32 to vector<8x4xi32>
    %117 = arith.cmpi eq, %115, %116 : vector<8x4xi32>
    %118 = arith.mulf %114, %97 : vector<8x1xf32>
    %c1_i32 = arith.constant 1 : i32
    %119 = vector.broadcast %c1_i32 : i32 to vector<8x4xi32>
    %120 = arith.cmpi eq, %115, %119 : vector<8x4xi32>
    %c2_i32 = arith.constant 2 : i32
    %121 = vector.broadcast %c2_i32 : i32 to vector<8x4xi32>
    %122 = arith.cmpi eq, %115, %121 : vector<8x4xi32>
    %123 = arith.sitofp %93 : vector<8x1xi32> to vector<8x1xf32>
    %124 = vector.shape_cast %123 : vector<8x1xf32> to vector<8x1xf32>
    %125 = vector.broadcast %124 : vector<8x1xf32> to vector<8x4xf32>
    %126 = vector.shape_cast %86 : vector<8x1xf32> to vector<8x1xf32>
    %127 = vector.broadcast %126 : vector<8x1xf32> to vector<8x4xf32>
    %128 = arith.select %122, %125, %127 : vector<8x4xi1>, vector<8x4xf32>
    %129 = vector.shape_cast %97 : vector<8x1xf32> to vector<8x1xf32>
    %130 = vector.broadcast %129 : vector<8x1xf32> to vector<8x4xf32>
    %131 = arith.select %120, %130, %128 : vector<8x4xi1>, vector<8x4xf32>
    %132 = vector.shape_cast %118 : vector<8x1xf32> to vector<8x1xf32>
    %133 = vector.broadcast %132 : vector<8x1xf32> to vector<8x4xf32>
    %134 = arith.select %117, %133, %131 : vector<8x4xi1>, vector<8x4xf32>
    %c0_29 = arith.constant 0 : index
    %c0_30 = arith.constant 0 : index
    %135 = vector.load %arg4[%c0_29, %c0_30] : memref<8x4xf32, #tpu.memory_space<vmem>>, vector<8x4xf32>
    tpu.vector_store %arg4[%c0_29, %c0_30], %134 {strides = array<i32>} : memref<8x4xf32, #tpu.memory_space<vmem>>, vector<8x4xf32>,
    return
  }
  func.func @transform_0(%arg0: i32) -> i32 {
    %c0_i32 = arith.constant 0 : i32
    %c0_i32_0 = arith.constant 0 : i32
    return %c0_i32 : i32
  }
  func.func @transform_1(%arg0: i32) -> (i32, i32) {
    %c0_i32 = arith.constant 0 : i32
    %c0_i32_0 = arith.constant 0 : i32
    return %arg0, %c0_i32 : i32, i32
  }
  func.func @transform_2(%arg0: i32) -> (i32, i32) {
    %c0_i32 = arith.constant 0 : i32
    %c0_i32_0 = arith.constant 0 : i32
    return %arg0, %c0_i32 : i32, i32
  }
  func.func @transform_3(%arg0: i32) -> (i32, i32) {
    %c0_i32 = arith.constant 0 : i32
    %c0_i32_0 = arith.constant 0 : i32
    return %arg0, %c0_i32 : i32, i32
  }
}

</mosaic_0001>

<bundles_post_ra>
// kernel: tpu_custom_call.1
= control target key start
LH: loop header
LB: loop body
LE: loop exit
PB: predicated region body
PF: predicated region fallthrough
CT: control target
= control target key end

     0   :  { %9 = vsyncpa [#allocation4], 0  ;;  %s314_s0 = inlined_call_operand.<no memory space> [shape: f32[1], index: 0, kind: input, shape index: {}]   ;;  %s315_s1 = inlined_call_operand.hbm [shape: f32[8,32], index: 1, kind: input, shape index: {}]   ;;  %s316_s2 = inlined_call_operand.hbm [shape: f32[8,128], index: 2, kind: input, shape index: {}]   ;;  %s317_s3 = inlined_call_operand.vmem [shape: f32[8,4], index: 3, kind: output, shape index: {}]  }
   0x1   :  { %10 = vsyncpa [#allocation6], 0  ;;  %s253_s12 = smov [#allocation3]   ;;  %s254_s14 = smov [#allocation5]  }
   0x2   :  { %s19_s13 = sshll.u32 %s253_s12, 4  ;;  %s29_s15 = sshll.u32 %s254_s14, 4  ;;  %s20_s13 = int_to_ptr.vmem [resolvable:$true] %s19_s13  ;;  %s30_s15 = int_to_ptr.vmem [resolvable:$true] %s29_s15 }
   0x3   :  { %s217_s16 = scalar_lea.vmem %s20_s13, 128  ;;  %p222_p1 = scmp.lt.s32.totalorder %s20_s13, %s20_s13 }
   0x4   :  { %p218_p0 = scmp.ne.s32.totalorder %s20_s13, %s217_s16  ;;  %p223_p2 = scmp.lt.s32.totalorder %s217_s16, %s217_s16 }
   0x6   :  { %p224_p3 = por %p223_p2, %p222_p1 }
   0x8   :  { %p225_p4 = pnand %p224_p3, %p218_p0 }
   0xa   :  { %228 = shalt.err (!%p225_p4)
}
   0xb   :  { %22 = dma.hbm_to_vmem [thread:$0]  %s315_s1, 128, %s20_s13, [#allocation4]  }
   0xc   :  { %s237_s19 = scalar_lea.vmem %s30_s15, 128  ;;  %p242_p6 = scmp.lt.s32.totalorder %s30_s15, %s30_s15 }
   0xd   :  { %p238_p5 = scmp.ne.s32.totalorder %s30_s15, %s237_s19  ;;  %p243_p7 = scmp.lt.s32.totalorder %s237_s19, %s237_s19 }
   0xf   :  { %p244_p8 = por %p243_p7, %p242_p6 }
  0x11   :  { %p245_p9 = pnand %p244_p8, %p238_p5 }
  0x13   :  { %248 = shalt.err (!%p245_p9)
}
  0x14   :  { %32 = dma.hbm_to_vmem [thread:$0]  %s316_s2, 128, %s30_s15, [#allocation6]  }
  0x15   :  { %249 = dma.done.wait [#allocation4], 128  }
  0x16   :  { %250 = vsyncadd [#allocation4], 4294967168 }
  0x17   :  { %251 = dma.done.wait [#allocation6], 128  }
  0x18   :  { %252 = vsyncadd [#allocation6], 4294967168  ;;  %vm43_vm0 = vcmask 261120   ;;  %vm59_vm1 = vcmask 785920   ;;  %v40_v0 = vld [vmem:[#allocation5] sm:$0xff]  ;;  %vm51_vm2 = vcmask 523520   ;;  %v41_v5 = vlaneseq }
  0x19   :  { %vm67_vm3 = vcmask 1048320   ;;  %v44_v1 = vsel %vm43_vm0, %v40_v0, -inf  ;;  %v60_v2 = vsel %vm59_vm1, %v40_v0, -inf  ;;  %v52_v3 = vsel %vm51_vm2, %v40_v0, -inf  ;;  %s255_s1 = smov 64   ;;  %s256_s2 = smov 96  }
  0x1a   :  { %45 = vmax.xlane.f32.xlu0 %v44_v1  ;;  %61 = vmax.xlane.f32.xlu1 %v60_v2  ;;  %v68_v4 = vsel %vm67_vm3, %v40_v0, -inf  ;;  %v286_v6 = vand.u32 127, %v41_v5  ;;  %s257_s22 = smov 32   ;;  %v153_v50 = vld [vmem:[#allocation3] sm:$0xff]  ;;  %vm180_vm3 = vcmask 31744  }
  0x1b   :  { %v154_v51 = vsel %vm43_vm0, %v153_v50, -inf }
  0x1c   :  { %vm55_vm4 = vcmp.ge.s32.totalorder %v286_v6, 32  ;;  %vm56_vm5 = vcmp.lt.s32.totalorder %v286_v6, 64  ;;  %vm63_vm6 = vcmp.ge.s32.totalorder %v286_v6, 64  ;;  %vm64_vm7 = vcmp.lt.s32.totalorder %v286_v6, 96 }
  0x1d   :  { %vm48_vm8 = vcmp.lt.s32.totalorder %v286_v6, 32  ;;  %vm57_vm9 = vmand %vm55_vm4, %vm56_vm5  ;;  %vm71_vm11 = vcmp.ge.s32.totalorder %v286_v6, 96  ;;  %vm175_vm15 = vcmp.eq.s32.totalorder %v286_v6, 2  ;;  %vm174_vm2 = vcmp.eq.s32.totalorder %v286_v6, 1 }
  0x1e   :  { %53 = vmax.xlane.f32.xlu0 %v52_v3  ;;  %69 = vmax.xlane.f32.xlu1 %v68_v4  ;;  %vm65_vm10 = vmand %vm63_vm6, %vm64_vm7 }
  0xa3   :  { %v46_v7 = vpop.xlane.xlu0 %45  ;;  %v62_v8 = vpop.xlane.xlu1 %61 }
  0xa4   :  { %v50_v9 = vsel %vm48_vm8, %v46_v7, 0.0 }
  0xa7   :  { %v54_v10 = vpop.xlane.xlu0 %53  ;;  %v70_v11 = vpop.xlane.xlu1 %69 }
  0xa8   :  { %v58_v12 = vsel %vm57_vm9, %v54_v10, %v50_v9 }
  0xa9   :  { %v66_v13 = vsel %vm65_vm10, %v62_v8, %v58_v12  ;;  %v149_v8 = vstv %s314_s0 }
  0xaa   :  { %v74_v14 = vsel %vm71_vm11, %v70_v11, %v66_v13 }
  0xab   :  { %v75_v15 = vsub.f32 %v40_v0, %v74_v14  ;;  %v258_v14 = vmov 0.0  }
  0xad   :  { %v76_v16 = vmul.f32 1.442695, %v75_v15 }
  0xaf   :  { %195 = vpow2.f32 %v76_v16 }
  0xbc   :  { %v196_v17 = vpop.eup %195 }
  0xbd   :  { %100 = vrot.lane.b32.xlu1 %v196_v17, %s255_s1  ;;  %86 = vrot.lane.b32.xlu0 %v196_v17, %s256_s2  ;;  %v78_v24 = vsel %vm43_vm0, %v196_v17, 0.0 }
  0xc1   :  { %114 = vrot.lane.b32.xlu1 %v196_v17, %s257_s22 }
 0x12f   :  { %v101_v18 = vpop.permute.xlu1 %100  ;;  %v87_v19 = vpop.permute.xlu0 %86 }
 0x130   :  { %v103_v20 = vsel %vm43_vm0, %v101_v18, 0.0  ;;  %v89_v21 = vsel %vm43_vm0, %v87_v19, 0.0 }
 0x131   :  { %104 = vadd.xlane.f32.xlu0 %v103_v20  ;;  %90 = vadd.xlane.f32.xlu1 %v89_v21 }
 0x133   :  { %v115_v22 = vpop.permute.xlu1 %114 }
 0x134   :  { %v117_v23 = vsel %vm43_vm0, %v115_v22, 0.0 }
 0x135   :  { %118 = vadd.xlane.f32.xlu0 %v117_v23 }
 0x139   :  { %79 = vadd.xlane.f32.xlu0 %v78_v24 }
 0x1ba   :  { %v91_v25 = vpop.xlane.xlu1 %90  ;;  %v105_v26 = vpop.xlane.xlu0 %104 }
 0x1bb   :  { %197 = vrcp.f32 %v91_v25 }
 0x1bc   :  { %199 = vrcp.f32 %v105_v26 }
 0x1be   :  { %v119_v27 = vpop.xlane.xlu0 %118 }
 0x1bf   :  { %201 = vrcp.f32 %v119_v27 }
 0x1c2   :  { %v80_v34 = vpop.xlane.xlu0 %79 }
 0x1c3   :  { %203 = vrcp.f32 %v80_v34 }
 0x1c8   :  { %v198_v28 = vpop.eup %197 }
 0x1c9   :  { %v200_v29 = vpop.eup %199  ;;  %v94_v30 = vmul.f32 %v198_v28, %v196_v17 }
 0x1ca   :  { %v108_v31 = vmul.f32 %v200_v29, %v196_v17 }
 0x1cb   :  { %96 = vrot.lane.b32.xlu1 %v94_v30, %s256_s2 }
 0x1cc   :  { %v202_v32 = vpop.eup %201  ;;  %110 = vrot.lane.b32.xlu0 %v108_v31, %s255_s1 }
 0x1cd   :  { %v122_v33 = vmul.f32 %v202_v32, %v196_v17 }
 0x1cf   :  { %124 = vrot.lane.b32.xlu1 %v122_v33, %s257_s22 }
 0x1d0   :  { %v204_v35 = vpop.eup %203 }
 0x1d1   :  { %v83_v36 = vmul.f32 %v204_v35, %v196_v17 }
 0x23d   :  { %v97_v37 = vpop.permute.xlu1 %96 }
 0x23e   :  { %v99_v38 = vadd.f32 %v97_v37, %v83_v36  ;;  %v111_v39 = vpop.permute.xlu0 %110 }
 0x240   :  { %v113_v40 = vadd.f32 %v111_v39, %v99_v38 }
 0x241   :  { %v125_v41 = vpop.permute.xlu1 %124 }
 0x242   :  { %v127_v42 = vadd.f32 %v125_v41, %v113_v40 }
 0x244   :  { %v128_v43 = vmul.f32 0.25, %v127_v42 }
 0x246   :  { %v129_v44 = vsel %vm43_vm0, %v128_v43, -inf }
 0x247   :  { %130 = vmax.xlane.f32.xlu1 %v129_v44 }
 0x2d0   :  { %v131_v45 = vpop.xlane.xlu1 %130 }
 0x2d1   :  { %vm132_vm12 = vcmp.ge.f32.partialorder %v128_v43, %v131_v45  ;;  %vm150_vm1 = vcmp.ge.f32.partialorder %v131_v45, %v149_v8 }
 0x2d2   :  { %v133_v46 = vsel %vm132_vm12, %v286_v6, 32  ;;  %v188_v15 = vsel %vm150_vm1, 1.0, %v258_v14 }
 0x2d3   :  { %v134_v47 = vsel %vm43_vm0, %v133_v46, 2147483647 }
 0x2d4   :  { %v136_v48 = vshra.s32 %v134_v47, 16  ;;  %v135_v52 = vand.u32 65535, %v134_v47 }
 0x2d6   :  { %v138_v49 = vcvt.s32.f32 %v136_v48  ;;  %v137_v54 = vcvt.s32.f32 %v135_v52 }
 0x2d8   :  { %139 = vmin.xlane.f32.xlu0 %v138_v49 }
 0x2dc   :  { %155 = vmax.xlane.f32.xlu0 %v154_v51 }
 0x361   :  { %v140_v53 = vpop.xlane.xlu0 %139 }
 0x362   :  { %vm141_vm13 = vcmp.eq.f32.partialorder %v138_v49, %v140_v53  ;;  %v146_v61 = vcvt.f32.s32 %v140_v53 }
 0x363   :  { %v142_v55 = vsel %vm141_vm13, %v137_v54, inf }
 0x364   :  { %143 = vmin.xlane.f32.xlu1 %v142_v55  ;;  %v147_v63 = vshll.u32 %v146_v61, 16 }
 0x365   :  { %v156_v56 = vpop.xlane.xlu0 %155 }
 0x366   :  { %v157_v57 = vsub.f32 %v153_v50, %v156_v56 }
 0x368   :  { %v158_v58 = vmul.f32 1.442695, %v157_v57 }
 0x36a   :  { %205 = vpow2.f32 %v158_v58 }
 0x377   :  { %v206_v59 = vpop.eup %205 }
 0x378   :  { %v160_v60 = vsel %vm43_vm0, %v206_v59, 0.0 }
 0x379   :  { %161 = vadd.xlane.f32.xlu0 %v160_v60 }
 0x3ed   :  { %v144_v62 = vpop.xlane.xlu1 %143 }
 0x3ee   :  { %v145_v0 = vcvt.f32.s32 %v144_v62 }
 0x3f0   :  { %v148_v1 = vadd.s32 %v147_v63, %v145_v0 }
 0x3f2   :  { %vm166_vm14 = vcmp.eq.s32.totalorder %v286_v6, %v148_v1  ;;  %v176_v9 = vcvt.s32.f32 %v148_v1 }
 0x3f3   :  { %v167_v2 = vsel %vm166_vm14, %v153_v50, -3.4028235e+38 }
 0x3f4   :  { %v168_v3 = vsel %vm43_vm0, %v167_v2, -inf  ;;  %v177_v12 = vsel %vm175_vm15, %v176_v9, %v131_v45  ;;  %vm172_vm0 = vcmp.eq.s32.totalorder %v286_v6, 0 }
 0x3f5   :  { %169 = vmax.xlane.f32.xlu1 %v168_v3  ;;  %v178_v17 = vsel %vm174_vm2, %v188_v15, %v177_v12 }
 0x402   :  { %v162_v4 = vpop.xlane.xlu0 %161 }
 0x403   :  { %207 = vlog2.f32 %v162_v4 }
 0x410   :  { %v208_v5 = vpop.eup %207 }
 0x411   :  { %v164_v7 = vmul.f32 0.6931472, %v208_v5 }
 0x413   :  { %v165_v10 = vadd.f32 %v164_v7, %v156_v56 }
 0x47e   :  { %v170_v11 = vpop.xlane.xlu1 %169 }
 0x47f   :  { %v171_v13 = vsub.f32 %v165_v10, %v170_v11 }
 0x481   :  { %v173_v16 = vmul.f32 %v188_v15, %v171_v13 }
 0x483   :  { %v179_v18 = vsel %vm172_vm0, %v173_v16, %v178_v17 }
 0x484   :  { %181 = vst.msk [vmem:[%s317_s3] sm:$0xff] %vm180_vm3, %v179_v18 }
 0x485   :  { %186 = vsyncpa [#allocation4], 1 }
 0x486   :  { %187 = vsyncpa [#allocation6], 1 }

</bundles_post_ra>
